<compile_context>
chip_gen: v6e
topology: v6e:2x2x1
jax: 0.10.0
libtpu: 0.0.40
codegen_flags: <defaults>
</compile_context>

<pallas_src>
import jax
import jax.numpy as jnp
from jax.experimental import pallas as pl
from jax.experimental.pallas import tpu as pltpu


def glu_kernel(x_ref, ctx_ref, w1_ref, b1_ref, w2_ref, b2_ref, o_ref):
    # fc_1 + sigmoid  (gate: [TB, input_size])
    # bf16 MXU matmul, f32 accumulation; bias add + sigmoid in f32.
    pre_gate = (
        jnp.dot(ctx_ref[...], w1_ref[...], preferred_element_type=jnp.float32)
        + b1_ref[...]
    )
    gate = jax.nn.sigmoid(pre_gate)                 # f32 on the EUP (own slot)

    # Element-wise gating in f32, then truncate to bf16 for the second matmul.
    gated = (gate * x_ref[...].astype(jnp.float32)).astype(jnp.bfloat16)

    # fc_2  (output: [TB, output_size]) — bf16 MXU, f32 accumulate.
    out = (
        jnp.dot(gated, w2_ref[...], preferred_element_type=jnp.float32)
        + b2_ref[...]
    )
    o_ref[...] = out.astype(o_ref.dtype)


def _pick_batch_tile(B, tb_max):
    """Single fat step when the whole batch fits; else the largest divisor of B
    that is a multiple of 8 and <= tb_max.  Returns (tb, needs_pad)."""
    if B <= max(tb_max, 512):
        return B, False
    for cand in range(tb_max, 7, -1):
        if cand % 8 == 0 and B % cand == 0:
            return cand, False
    return tb_max, True  # rare fallback: pad the batch


def glu_forward(x, context, w1_t, b1, w2_t, b2, *, tb_max=256, out_dtype=None):
    """x: [B, input_size], context: [B, context_size]
    w1_t: [context_size, input_size], b1: [1, input_size]
    w2_t: [input_size, output_size], b2: [1, output_size]
    returns: [B, output_size]
    """
    B, input_size = x.shape
    context_size = context.shape[1]
    output_size = w2_t.shape[1]
    out_dtype = out_dtype if out_dtype is not None else x.dtype

    # bf16 operands for the MXU (inference-style); biases stay f32 for the
    # f32 bias add.  Ideally the caller already supplies bf16 activations.
    x_b = x.astype(jnp.bfloat16)
    ctx_b = context.astype(jnp.bfloat16)
    w1_b = w1_t.astype(jnp.bfloat16)
    w2_b = w2_t.astype(jnp.bfloat16)
    b1_f = b1.astype(jnp.float32)
    b2_f = b2.astype(jnp.float32)

    tb, needs_pad = _pick_batch_tile(B, tb_max)
    pad = 0
    if needs_pad:
        # Last-resort only (huge batch with no usable divisor).  Padded rows
        # produce garbage (sigmoid(b1)*0 + b2) and are sliced off below.
        pad = pl.cdiv(B, tb) * tb - B
        x_b = jnp.pad(x_b, ((0, pad), (0, 0)))
        ctx_b = jnp.pad(ctx_b, ((0, pad), (0, 0)))
    padded_b = B + pad
    grid_b = padded_b // tb

    # Weight/bias blocks never change across grid steps; single-buffer them
    # when there is an actual multi-step pipeline.
    w_mode = pl.Buffered(1) if grid_b > 1 else None

    out = pl.pallas_call(
        glu_kernel,
        out_shape=jax.ShapeDtypeStruct((padded_b, output_size), out_dtype),
        grid=(grid_b,),
        in_specs=[
            # Activations: tiled over the batch grid axis (pipelined DMA).
            pl.BlockSpec((tb, input_size), lambda i: (i, 0)),
            pl.BlockSpec((tb, context_size), lambda i: (i, 0)),
            # Weights / biases: full blocks, VMEM-resident across grid steps.
            pl.BlockSpec((context_size, input_size), lambda i: (0, 0),
                         pipeline_mode=w_mode),
            pl.BlockSpec((1, input_size), lambda i: (0, 0), pipeline_mode=w_mode),
            pl.BlockSpec((input_size, output_size), lambda i: (0, 0),
                         pipeline_mode=w_mode),
            pl.BlockSpec((1, output_size), lambda i: (0, 0), pipeline_mode=w_mode),
        ],
        out_specs=pl.BlockSpec((tb, output_size), lambda i: (i, 0)),
        compiler_params=pltpu.CompilerParams(
            # Megacore sharding only pays off when there are several fat steps.
            dimension_semantics=("parallel",) if grid_b > 1 else ("arbitrary",),
        ),
    )(x_b, ctx_b, w1_b, b1_f, w2_b, b2_f)

    return out[:B] if pad else out


if __name__ == "__main__":
    # Small shapes consistent with the module defaults.
    B = 64                    # batch rows -> single grid step (tb = 64)
    input_size = 384          # fc_1 out / fc_2 in
    context_size = 128        # MP.scalar_context_dim (synthetic choice)
    output_size = 256         # fc_2 out

    key = jax.random.PRNGKey(0)
    kx, kc, kw1, kb1, kw2, kb2 = jax.random.split(key, 6)

    x = jax.random.normal(kx, (B, input_size), dtype=jnp.float32)
    context = jax.random.normal(kc, (B, context_size), dtype=jnp.float32)

    # Deterministic parameter init (Linear weights stored transposed: [in, out]).
    w1_t = jax.random.normal(kw1, (context_size, input_size), jnp.float32) * 0.02
    b1 = jax.random.normal(kb1, (1, input_size), jnp.float32) * 0.02
    w2_t = jax.random.normal(kw2, (input_size, output_size), jnp.float32) * 0.02
    b2 = jax.random.normal(kb2, (1, output_size), jnp.float32) * 0.02

    out = glu_forward(x, context, w1_t, b1, w2_t, b2)
    out = jax.block_until_ready(out)
    assert out.shape == (B, output_size)

    # Reference 1: emulate the same bf16 casts in plain JAX (tight tolerance).
    x_bf = x.astype(jnp.bfloat16).astype(jnp.float32)
    pre_ref = (
        jnp.dot(
            context.astype(jnp.bfloat16),
            w1_t.astype(jnp.bfloat16),
            preferred_element_type=jnp.float32,
        )
        + b1
    )
    gate_ref = jax.nn.sigmoid(pre_ref)
    gated_ref = (gate_ref * x_bf).astype(jnp.bfloat16)
    ref_bf16 = (
        jnp.dot(gated_ref, w2_t.astype(jnp.bfloat16), preferred_element_type=jnp.float32)
        + b2
    )
    assert jnp.allclose(out, ref_bf16, atol=2e-3, rtol=2e-3)

    # Reference 2: pure f32 PyTorch-equivalent math (loose tolerance; documents
    # the bf16 weight/activation approximation adopted for performance).
    gate_f32 = jax.nn.sigmoid(context @ w1_t + b1)
    ref_f32 = (gate_f32 * x) @ w2_t + b2
    assert jnp.allclose(out, ref_f32, atol=3e-2, rtol=3e-2)

    print("KERNEL_OK")
</pallas_src>

<mosaic_0001>
module attributes {stable_mosaic.version = 11 : i64} {
  func.func @glu_kernel(%arg0: i32, %arg1: memref<64x384xbf16, #tpu.memory_space<vmem>>, %arg2: memref<64x128xbf16, #tpu.memory_space<vmem>>, %arg3: memref<128x384xbf16, #tpu.memory_space<vmem>>, %arg4: memref<1x384xf32, #tpu.memory_space<vmem>>, %arg5: memref<384x256xbf16, #tpu.memory_space<vmem>>, %arg6: memref<1x256xf32, #tpu.memory_space<vmem>>, %arg7: memref<64x256xf32, #tpu.memory_space<vmem>>) attributes {dimension_semantics = [#tpu.dimension_semantics<arbitrary>], iteration_bounds = array<i64: 1>, scalar_prefetch = 0 : i64, scratch_operands = 0 : i64, tpu.core_type = #tpu.core_type<tc>, window_params = [{transform_indices = @transform_0, window_bounds = array<i64: 64, 384>}, {transform_indices = @transform_1, window_bounds = array<i64: 64, 128>}, {pipeline_mode = #tpu.pipeline_mode<synchronous>, transform_indices = @transform_2, window_bounds = array<i64: 128, 384>}, {pipeline_mode = #tpu.pipeline_mode<synchronous>, transform_indices = @transform_3, window_bounds = array<i64: 1, 384>}, {pipeline_mode = #tpu.pipeline_mode<synchronous>, transform_indices = @transform_4, window_bounds = array<i64: 384, 256>}, {pipeline_mode = #tpu.pipeline_mode<synchronous>, transform_indices = @transform_5, window_bounds = array<i64: 1, 256>}, {transform_indices = @transform_6, window_bounds = array<i64: 64, 256>}]} {
    %c0 = arith.constant 0 : index
    %c0_0 = arith.constant 0 : index
    %0 = vector.load %arg2[%c0, %c0_0] : memref<64x128xbf16, #tpu.memory_space<vmem>>, vector<64x128xbf16>
    %c0_1 = arith.constant 0 : index
    %c0_2 = arith.constant 0 : index
    %1 = vector.load %arg3[%c0_1, %c0_2] : memref<128x384xbf16, #tpu.memory_space<vmem>>, vector<128x384xbf16>
    %cst = arith.constant dense<0.000000e+00> : vector<64x384xf32>
    %2 = tpu.matmul %0, %1, %cst {dimension_numbers = #tpu.dot_dimension_numbers<[1], [0], [0], [1], [0, 0, 1, 1], [], []>} : vector<64x128xbf16>, vector<128x384xbf16>, vector<64x384xf32> -> vector<64x384xf32>
    %c0_3 = arith.constant 0 : index
    %c0_4 = arith.constant 0 : index
    %3 = vector.load %arg4[%c0_3, %c0_4] : memref<1x384xf32, #tpu.memory_space<vmem>>, vector<1x384xf32>
    %4 = vector.broadcast %3 : vector<1x384xf32> to vector<64x384xf32>
    %5 = arith.addf %2, %4 : vector<64x384xf32>
    %6 = arith.negf %5 : vector<64x384xf32>
    %7 = math.exp %6 : vector<64x384xf32>
    %cst_5 = arith.constant 1.000000e+00 : f32
    %8 = vector.broadcast %cst_5 : f32 to vector<64x384xf32>
    %9 = arith.addf %8, %7 : vector<64x384xf32>
    %10 = arith.divf %8, %9 : vector<64x384xf32>
    %c0_6 = arith.constant 0 : index
    %c0_7 = arith.constant 0 : index
    %11 = vector.load %arg1[%c0_6, %c0_7] : memref<64x384xbf16, #tpu.memory_space<vmem>>, vector<64x384xbf16>
    %12 = arith.extf %11 : vector<64x384xbf16> to vector<64x384xf32>
    %13 = arith.mulf %10, %12 : vector<64x384xf32>
    %14 = arith.truncf %13 : vector<64x384xf32> to vector<64x384xbf16>
    %c0_8 = arith.constant 0 : index
    %c0_9 = arith.constant 0 : index
    %15 = vector.load %arg5[%c0_8, %c0_9] : memref<384x256xbf16, #tpu.memory_space<vmem>>, vector<384x256xbf16>
    %cst_10 = arith.constant dense<0.000000e+00> : vector<64x256xf32>
    %16 = tpu.matmul %14, %15, %cst_10 {dimension_numbers = #tpu.dot_dimension_numbers<[1], [0], [0], [1], [0, 0, 1, 1], [], []>} : vector<64x384xbf16>, vector<384x256xbf16>, vector<64x256xf32> -> vector<64x256xf32>
    %c0_11 = arith.constant 0 : index
    %c0_12 = arith.constant 0 : index
    %17 = vector.load %arg6[%c0_11, %c0_12] : memref<1x256xf32, #tpu.memory_space<vmem>>, vector<1x256xf32>
    %18 = vector.broadcast %17 : vector<1x256xf32> to vector<64x256xf32>
    %19 = arith.addf %16, %18 : vector<64x256xf32>
    %c0_13 = arith.constant 0 : index
    %c0_14 = arith.constant 0 : index
    %20 = vector.load %arg7[%c0_13, %c0_14] : memref<64x256xf32, #tpu.memory_space<vmem>>, vector<64x256xf32>
    tpu.vector_store %arg7[%c0_13, %c0_14], %19 {strides = array<i32>} : memref<64x256xf32, #tpu.memory_space<vmem>>, vector<64x256xf32>,
    return
  }
  func.func @transform_0(%arg0: i32) -> (i32, i32) {
    %c0_i32 = arith.constant 0 : i32
    %c0_i32_0 = arith.constant 0 : i32
    return %arg0, %c0_i32 : i32, i32
  }
  func.func @transform_1(%arg0: i32) -> (i32, i32) {
    %c0_i32 = arith.constant 0 : i32
    %c0_i32_0 = arith.constant 0 : i32
    return %arg0, %c0_i32 : i32, i32
  }
  func.func @transform_2(%arg0: i32) -> (i32, i32) {
    %c0_i32 = arith.constant 0 : i32
    %c0_i32_0 = arith.constant 0 : i32
    %c0_i32_1 = arith.constant 0 : i32
    return %c0_i32, %c0_i32_0 : i32, i32
  }
  func.func @transform_3(%arg0: i32) -> (i32, i32) {
    %c0_i32 = arith.constant 0 : i32
    %c0_i32_0 = arith.constant 0 : i32
    %c0_i32_1 = arith.constant 0 : i32
    return %c0_i32, %c0_i32_0 : i32, i32
  }
  func.func @transform_4(%arg0: i32) -> (i32, i32) {
    %c0_i32 = arith.constant 0 : i32
    %c0_i32_0 = arith.constant 0 : i32
    %c0_i32_1 = arith.constant 0 : i32
    return %c0_i32, %c0_i32_0 : i32, i32
  }
  func.func @transform_5(%arg0: i32) -> (i32, i32) {
    %c0_i32 = arith.constant 0 : i32
    %c0_i32_0 = arith.constant 0 : i32
    %c0_i32_1 = arith.constant 0 : i32
    return %c0_i32, %c0_i32_0 : i32, i32
  }
  func.func @transform_6(%arg0: i32) -> (i32, i32) {
    %c0_i32 = arith.constant 0 : i32
    %c0_i32_0 = arith.constant 0 : i32
    return %arg0, %c0_i32 : i32, i32
  }
}

</mosaic_0001>

<bundles_post_ra>
// kernel: tpu_custom_call.1
= control target key start
LH: loop header
LB: loop body
LE: loop exit
PB: predicated region body
PF: predicated region fallthrough
CT: control target
= control target key end

     0   :  { %11 = vsyncpa [#allocation3], 0  ;;  %s1721_s0 = inlined_call_operand.hbm [shape: bf16[64,384], index: 0, kind: input, shape index: {}]   ;;  %s1722_s1 = inlined_call_operand.hbm [shape: bf16[64,128], index: 1, kind: input, shape index: {}]   ;;  %s1723_s2 = inlined_call_operand.hbm [shape: bf16[128,384], index: 2, kind: input, shape index: {}]   ;;  %s1724_s3 = inlined_call_operand.vmem [shape: f32[1,384], index: 3, kind: input, shape index: {}]   ;;  %s1725_s4 = inlined_call_operand.hbm [shape: bf16[384,256], index: 4, kind: input, shape index: {}]   ;;  %s1726_s5 = inlined_call_operand.vmem [shape: f32[1,256], index: 5, kind: input, shape index: {}]   ;;  %s1727_s6 = inlined_call_operand.hbm [shape: f32[64,256], index: 6, kind: output, shape index: {}]  }
   0x1   :  { %12 = vsyncpa [#allocation6], 0 }
   0x2   :  { %13 = vsyncpa [#allocation9], 0 }
   0x3   :  { %14 = vsyncpa [#allocation4], 0  ;;  %s1590_s21 = smov [#allocation5]  }
   0x4   :  { %s32_s22 = sshll.u32 %s1590_s21, 4  ;;  %s33_s22 = int_to_ptr.vmem [resolvable:$true] %s32_s22 }
   0x5   :  { %s1490_s23 = scalar_lea.vmem %s33_s22, 512  ;;  %p1495_p1 = scmp.lt.s32.totalorder %s33_s22, %s33_s22 }
   0x6   :  { %p1491_p0 = scmp.ne.s32.totalorder %s33_s22, %s1490_s23  ;;  %p1496_p2 = scmp.lt.s32.totalorder %s1490_s23, %s1490_s23 }
   0x8   :  { %p1497_p3 = por %p1496_p2, %p1495_p1 }
   0xa   :  { %p1498_p4 = pnand %p1497_p3, %p1491_p0 }
   0xc   :  { %1501 = shalt.err (!%p1498_p4)
}
   0xd   :  { %s1591_s24 = smov 64   ;;  %s1592_s25 = smov 4  }
   0xe   :  { %38 = dma.hbm_to_vmem [thread:$0]  %s1722_s1, 512, %s33_s22, [#allocation6], %s1591_s24, %s1591_s24, %s1592_s25  }
   0xf   :  { %s1593_s28 = smov [#allocation2]  }
  0x10   :  { %s20_s29 = sshll.u32 %s1593_s28, 4  ;;  %s21_s29 = int_to_ptr.vmem [resolvable:$true] %s20_s29 }
  0x11   :  { %s1510_s30 = scalar_lea.vmem %s21_s29, 1536  ;;  %p1515_p6 = scmp.lt.s32.totalorder %s21_s29, %s21_s29 }
  0x12   :  { %p1511_p5 = scmp.ne.s32.totalorder %s21_s29, %s1510_s30  ;;  %p1516_p7 = scmp.lt.s32.totalorder %s1510_s30, %s1510_s30 }
  0x14   :  { %p1517_p8 = por %p1516_p7, %p1515_p6 }
  0x16   :  { %p1518_p9 = pnand %p1517_p8, %p1511_p5 }
  0x18   :  { %1521 = shalt.err (!%p1518_p9)
}
  0x19   :  { %s1594_s7 = smov 192   ;;  %s1595_s8 = smov 12  }
  0x1a   :  { %26 = dma.hbm_to_vmem [thread:$0]  %s1721_s0, 1536, %s21_s29, [#allocation3], %s1594_s7, %s1594_s7, %s1595_s8  }
  0x1b   :  { %s1596_s11 = smov [#allocation7]   ;;  %s1597_s13 = smov [#allocation8]  }
  0x1c   :  { %s44_s12 = sshll.u32 %s1596_s11, 4  ;;  %s58_s1 = sshll.u32 %s1597_s13, 4  ;;  %s45_s12 = int_to_ptr.vmem [resolvable:$true] %s44_s12  ;;  %s59_s1 = int_to_ptr.vmem [resolvable:$true] %s58_s1 }
  0x1d   :  { %s1530_s14 = scalar_lea.vmem %s45_s12, 3072  ;;  %p1535_p11 = scmp.lt.s32.totalorder %s45_s12, %s45_s12 }
  0x1e   :  { %p1531_p10 = scmp.ne.s32.totalorder %s45_s12, %s1530_s14  ;;  %p1536_p12 = scmp.lt.s32.totalorder %s1530_s14, %s1530_s14 }
  0x20   :  { %p1537_p13 = por %p1536_p12, %p1535_p11 }
  0x22   :  { %p1538_p0 = pnand %p1537_p13, %p1531_p10 }
  0x24   :  { %1541 = shalt.err (!%p1538_p0)
}
  0x25   :  { %50 = dma.hbm_to_vmem [thread:$0]  %s1723_s2, 3072, %s45_s12, [#allocation6], %s1594_s7, %s1594_s7, %s1595_s8  }
  0x26   :  { %s1550_s17 = scalar_lea.vmem %s59_s1, 6144  ;;  %p1555_p2 = scmp.lt.s32.totalorder %s59_s1, %s59_s1 }
  0x27   :  { %p1551_p1 = scmp.ne.s32.totalorder %s59_s1, %s1550_s17  ;;  %p1556_p3 = scmp.lt.s32.totalorder %s1550_s17, %s1550_s17 }
  0x29   :  { %p1557_p4 = por %p1556_p3, %p1555_p2 }
  0x2b   :  { %p1558_p5 = pnand %p1557_p4, %p1551_p1 }
  0x2d   :  { %1561 = shalt.err (!%p1558_p5)
}
  0x2e   :  { %s1598_s0 = smov 128   ;;  %s1599_s18 = smov 8  }
  0x2f   :  { %64 = dma.hbm_to_vmem [thread:$0]  %s1725_s4, 6144, %s59_s1, [#allocation9], %s1598_s0, %s1598_s0, %s1599_s18  }
  0x30   :  { %1582 = dma.done.wait [#allocation3], 1536  }
  0x31   :  { %1583 = vsyncadd [#allocation3], 4294965760 }
  0x32   :  { %1584 = dma.done.wait [#allocation6], 3584  }
  0x33   :  { %1585 = vsyncadd [#allocation6], 4294963712 }
  0x34   :  { %1586 = dma.done.wait [#allocation9], 6144  }
  0x35   :  { %1587 = vsyncadd [#allocation9], 4294961152  ;;  %v1600_v0 = vmov 0   ;;  %v1278_v1 = vld [vmem:[#allocation7 + $0xac] ss:$12 sps:$4 sm:$0xff]   ;;  %v1310_v19 = vld [vmem:[#allocation5] sm:$0xff]  }
  0x36   :  { %321 = vmatprep.mubr.bf16.mxu0 %v1600_v0  ;;  %v1280_v2 = vld [vmem:[#allocation7 + $0xb0] ss:$12 sps:$4 sm:$0xff]   ;;  %289 = vmatprep.subr.bf16.mxu0 %v1278_v1  ;;  %v1281_v3 = vld [vmem:[#allocation7 + $0xa8] ss:$12 sps:$4 sm:$0xff]   ;;  %v1284_v5 = vld [vmem:[#allocation7 + $0x98] ss:$12 sps:$4 sm:$0xff]  }
  0x37   :  { %1240 = vmatprep.subr.bf16.mxu1 %v1280_v2  ;;  %v1282_v4 = vld [vmem:[#allocation7 + $0x94] ss:$12 sps:$4 sm:$0xff]   ;;  %290 = vmatpush1.bf16.msra.mxu0 %v1281_v3  ;;  %v1285_v6 = vld [vmem:[#allocation7 + $0x90] ss:$12 sps:$4 sm:$0xff]   ;;  %v1289_v9 = vld [vmem:[#allocation7 + $0x78] ss:$12 sps:$4 sm:$0xff]  }
  0x38   :  { %1241 = vmatpush3.bf16.msra.mxu1 %v1280_v2  ;;  %291 = vmatprep.subr.bf16.mxu0 %v1282_v4  ;;  %v1286_v7 = vld [vmem:[#allocation7 + $0x7c] ss:$12 sps:$4 sm:$0xff]   ;;  %v1288_v8 = vld [vmem:[#allocation7 + $0x80] ss:$12 sps:$4 sm:$0xff]   ;;  %v1290_v10 = vld [vmem:[#allocation7 + $0x64] ss:$12 sps:$4 sm:$0xff]  }
  0x39   :  { %1242 = vmatprep.subr.bf16.mxu1 %v1284_v5  ;;  %v1292_v11 = vld [vmem:[#allocation7 + $0x68] ss:$12 sps:$4 sm:$0xff]   ;;  %v1293_v12 = vld [vmem:[#allocation7 + $0x60] ss:$12 sps:$4 sm:$0xff]   ;;  %v1296_v14 = vld [vmem:[#allocation7 + $0x50] ss:$12 sps:$4 sm:$0xff]   ;;  %1256 = vmatprep.mubr.bf16.mxu1 %v1310_v19 }
  0x3a   :  { %v1294_v13 = vld [vmem:[#allocation7 + $0x4c] ss:$12 sps:$4 sm:$0xff]   ;;  %v1297_v15 = vld [vmem:[#allocation7 + $0x48] ss:$12 sps:$4 sm:$0xff]   ;;  %v1301_v18 = vld [vmem:[#allocation7 + $0x30] ss:$12 sps:$4 sm:$0xff]  }
  0x3b   :  { %292 = vmatpush1.bf16.msra.mxu0 %v1285_v6  ;;  %v1298_v16 = vld [vmem:[#allocation7 + $0x34] ss:$12 sps:$4 sm:$0xff]   ;;  %v1300_v17 = vld [vmem:[#allocation7 + $0x38] ss:$12 sps:$4 sm:$0xff]   ;;  %v1302_v20 = vld [vmem:[#allocation7 + $0x1c] ss:$12 sps:$4 sm:$0xff]  }
  0x3c   :  { %1243 = vmatpush3.bf16.msra.mxu1 %v1284_v5  ;;  %293 = vmatprep.subr.bf16.mxu0 %v1286_v7  ;;  %v1304_v21 = vld [vmem:[#allocation7 + $0x20] ss:$12 sps:$4 sm:$0xff]   ;;  %v1305_v22 = vld [vmem:[#allocation7 + $0x18] ss:$12 sps:$4 sm:$0xff]   ;;  %v1308_v24 = vld [vmem:[#allocation7 + $0x8] ss:$12 sps:$4 sm:$0xff]  }
  0x3d   :  { %1244 = vmatprep.subr.bf16.mxu1 %v1288_v8  ;;  %v1306_v23 = vld [vmem:[#allocation7 + $0x4] ss:$12 sps:$4 sm:$0xff]   ;;  %v1309_v25 = vld [vmem:[#allocation7] ss:$12 sps:$4 sm:$0xff]   ;;  %v1316_v27 = vld [vmem:[#allocation8 + $0x74] ss:$8 sps:$4 sm:$0xff]  }
  0x3e   :  { %v1311_v26 = vld [vmem:[#allocation5 + $0x8] sm:$0xff]   ;;  %v1312_v28 = vld [vmem:[#allocation5 + $0x10] sm:$0xff]   ;;  %v1313_v33 = vld [vmem:[#allocation5 + $0x18] sm:$0xff]  }
  0x3f   :  { %294 = vmatpush1.bf16.msra.mxu0 %v1289_v9  ;;  %v1314_v29 = vld [vmem:[#allocation8 + $0x70] ss:$8 sps:$4 sm:$0xff]   ;;  %v1319_v30 = vld [vmem:[#allocation8 + $0x64] ss:$8 sps:$4 sm:$0xff]   ;;  %v1317_v31 = vld [vmem:[#allocation8 + $0x60] ss:$8 sps:$4 sm:$0xff]  }
  0x40   :  { %1245 = vmatpush3.bf16.msra.mxu1 %v1288_v8  ;;  %295 = vmatprep.subr.bf16.mxu0 %v1290_v10  ;;  %v1322_v32 = vld [vmem:[#allocation8 + $0x54] ss:$8 sps:$4 sm:$0xff]   ;;  %v1320_v34 = vld [vmem:[#allocation8 + $0x50] ss:$8 sps:$4 sm:$0xff]   ;;  %v1325_v35 = vld [vmem:[#allocation8 + $0x44] ss:$8 sps:$4 sm:$0xff]  }
  0x41   :  { %1246 = vmatprep.subr.bf16.mxu1 %v1292_v11  ;;  %v1323_v36 = vld [vmem:[#allocation8 + $0x40] ss:$8 sps:$4 sm:$0xff]   ;;  %v1328_v37 = vld [vmem:[#allocation8 + $0x34] ss:$8 sps:$4 sm:$0xff]   ;;  %v1326_v38 = vld [vmem:[#allocation8 + $0x30] ss:$8 sps:$4 sm:$0xff]  }
  0x42   :  { %v1331_v39 = vld [vmem:[#allocation8 + $0x24] ss:$8 sps:$4 sm:$0xff]   ;;  %v1329_v40 = vld [vmem:[#allocation8 + $0x20] ss:$8 sps:$4 sm:$0xff]   ;;  %v1334_v41 = vld [vmem:[#allocation8 + $0x14] ss:$8 sps:$4 sm:$0xff]  }
  0x43   :  { %296 = vmatpush1.bf16.msra.mxu0 %v1293_v12  ;;  %v1332_v42 = vld [vmem:[#allocation8 + $0x10] ss:$8 sps:$4 sm:$0xff]   ;;  %v1337_v43 = vld [vmem:[#allocation8 + $0x4] ss:$8 sps:$4 sm:$0xff]   ;;  %v1335_v44 = vld [vmem:[#allocation8] ss:$8 sps:$4 sm:$0xff]  }
  0x44   :  { %1247 = vmatpush3.bf16.msra.mxu1 %v1292_v11  ;;  %297 = vmatprep.subr.bf16.mxu0 %v1294_v13  ;;  %v1340_v45 = vld [vmem:[#allocation8 + $0x174] ss:$8 sps:$4 sm:$0xff]   ;;  %v1338_v46 = vld [vmem:[#allocation8 + $0x170] ss:$8 sps:$4 sm:$0xff]   ;;  %v1346_v49 = vld [vmem:[#allocation8 + $0x164] ss:$8 sps:$4 sm:$0xff]  }
  0x45   :  { %1248 = vmatprep.subr.bf16.mxu1 %v1296_v14  ;;  %v1343_v47 = vld [vmem:[#allocation8 + $0xf4] ss:$8 sps:$4 sm:$0xff]   ;;  %v1341_v48 = vld [vmem:[#allocation8 + $0xf0] ss:$8 sps:$4 sm:$0xff]   ;;  %v1344_v50 = vld [vmem:[#allocation8 + $0x160] ss:$8 sps:$4 sm:$0xff]  }
  0x46   :  { %v1349_v51 = vld [vmem:[#allocation8 + $0xe4] ss:$8 sps:$4 sm:$0xff]   ;;  %v1347_v52 = vld [vmem:[#allocation8 + $0xe0] ss:$8 sps:$4 sm:$0xff]   ;;  %v1352_v53 = vld [vmem:[#allocation8 + $0x154] ss:$8 sps:$4 sm:$0xff]  }
  0x47   :  { %298 = vmatpush1.bf16.msra.mxu0 %v1297_v15  ;;  %v1350_v54 = vld [vmem:[#allocation8 + $0x150] ss:$8 sps:$4 sm:$0xff]   ;;  %v1355_v55 = vld [vmem:[#allocation8 + $0xd4] ss:$8 sps:$4 sm:$0xff]   ;;  %v1358_v57 = vld [vmem:[#allocation8 + $0x144] ss:$8 sps:$4 sm:$0xff]  }
  0x48   :  { %1249 = vmatpush3.bf16.msra.mxu1 %v1296_v14  ;;  %299 = vmatprep.subr.bf16.mxu0 %v1298_v16  ;;  %v1353_v56 = vld [vmem:[#allocation8 + $0xd0] ss:$8 sps:$4 sm:$0xff]   ;;  %v1356_v58 = vld [vmem:[#allocation8 + $0x140] ss:$8 sps:$4 sm:$0xff]   ;;  %v1361_v59 = vld [vmem:[#allocation8 + $0xc4] ss:$8 sps:$4 sm:$0xff]   ;;  %v122_v14 = vlaneseq }
  0x49   :  { %1250 = vmatprep.subr.bf16.mxu1 %v1300_v17  ;;  %v1359_v60 = vld [vmem:[#allocation8 + $0xc0] ss:$8 sps:$4 sm:$0xff]   ;;  %v1364_v61 = vld [vmem:[#allocation8 + $0x134] ss:$8 sps:$4 sm:$0xff]   ;;  %v1362_v62 = vld [vmem:[#allocation8 + $0x130] ss:$8 sps:$4 sm:$0xff]  }
  0x4a   :  { %v1367_v63 = vld [vmem:[#allocation8 + $0xb4] ss:$8 sps:$4 sm:$0xff]   ;;  %v1365_v1 = vld [vmem:[#allocation8 + $0xb0] ss:$8 sps:$4 sm:$0xff]   ;;  %v1370_v2 = vld [vmem:[#allocation8 + $0x124] ss:$8 sps:$4 sm:$0xff]  }
  0x4b   :  { %300 = vmatpush1.bf16.msra.mxu0 %v1301_v18  ;;  %v1368_v3 = vld [vmem:[#allocation8 + $0x120] ss:$8 sps:$4 sm:$0xff]   ;;  %v1373_v4 = vld [vmem:[#allocation8 + $0xa4] ss:$8 sps:$4 sm:$0xff]   ;;  %v1376_v6 = vld [vmem:[#allocation8 + $0x114] ss:$8 sps:$4 sm:$0xff]  }
  0x4c   :  { %1251 = vmatpush3.bf16.msra.mxu1 %v1300_v17  ;;  %301 = vmatprep.subr.bf16.mxu0 %v1302_v20  ;;  %v1371_v5 = vld [vmem:[#allocation8 + $0xa0] ss:$8 sps:$4 sm:$0xff]   ;;  %v1374_v7 = vld [vmem:[#allocation8 + $0x110] ss:$8 sps:$4 sm:$0xff]   ;;  %v1379_v8 = vld [vmem:[#allocation8 + $0x94] ss:$8 sps:$4 sm:$0xff]  }
  0x4d   :  { %1252 = vmatprep.subr.bf16.mxu1 %v1304_v21  ;;  %v1377_v9 = vld [vmem:[#allocation8 + $0x90] ss:$8 sps:$4 sm:$0xff]   ;;  %v1382_v10 = vld [vmem:[#allocation8 + $0x104] ss:$8 sps:$4 sm:$0xff]   ;;  %v1380_v11 = vld [vmem:[#allocation8 + $0x100] ss:$8 sps:$4 sm:$0xff]  }
  0x4e   :  { %v1385_v12 = vld [vmem:[#allocation8 + $0x84] ss:$8 sps:$4 sm:$0xff]   ;;  %v1383_v13 = vld [vmem:[#allocation8 + $0x80] ss:$8 sps:$4 sm:$0xff]   ;;  %v1656_v15 = vshrl.u32 %v122_v14, 7 }
  0x4f   :  { %302 = vmatpush1.bf16.msra.mxu0 %v1305_v22  ;;  %v120_v18 = vld [vmem:[%s1724_s3] sm:$0x7] }
  0x50   :  { %1253 = vmatpush3.bf16.msra.mxu1 %v1304_v21  ;;  %303 = vmatprep.subr.bf16.mxu0 %v1306_v23  ;;  %v124_v16 = vsub.s32 0, %v1656_v15  ;;  %v132_v17 = vsub.s32 2, %v1656_v15 }
  0x51   :  { %1254 = vmatprep.subr.bf16.mxu1 %v1308_v24 }
  0x52   :  { %v1666_v20 = vrot.slane %v120_v18, %v124_v16  ;;  %v133_v21 = vrot.slane %v120_v18, %v132_v17 }
  0x53   :  { %304 = vmatpush1.bf16.msra.mxu0 %v1309_v25 }
  0x54   :  { %1255 = vmatpush3.bf16.msra.mxu1 %v1308_v24  ;;  %947 = vmatprep.subr.bf16.mxu0 %v1316_v27 }
  0x55   :  { %1020 = vmatprep.subr.bf16.mxu1 %v1340_v45 }
  0x56   :  { %322 = vmatmul.mubr.bf16.vlgmr.msra.gmra.mxu0 %v1310_v19  ;;  %v128_v19 = vsub.s32 1, %v1656_v15 }
  0x57   :  { %1257 = vmatmul.mubr.bf16.vlgmr.msra.gmra.mxu1 %v1311_v26  ;;  %331 = vmatprep.mubr.bf16.mxu0 %v1600_v0 }
  0x58   :  { %1260 = vmatprep.mubr.bf16.mxu1 %v1312_v28  ;;  %948 = vmatpush1.bf16.msra.mxu0 %v1314_v29  ;;  %v1670_v22 = vrot.slane %v120_v18, %v128_v19 }
  0x59   :  { %949 = vmatprep.subr.bf16.mxu0 %v1319_v30  ;;  %1021 = vmatpush1.bf16.msra.mxu1 %v1338_v46 }
  0x5a   :  { %1022 = vmatprep.subr.bf16.mxu1 %v1346_v49 }
  0x5c   :  { %950 = vmatpush1.bf16.msra.mxu0 %v1317_v31 }
  0x5d   :  { %951 = vmatprep.subr.bf16.mxu0 %v1322_v32  ;;  %1023 = vmatpush1.bf16.msra.mxu1 %v1344_v50 }
  0x5e   :  { %332 = vmatmul.mubr.bf16.gmra.mxu0 %v1311_v26  ;;  %1024 = vmatprep.subr.bf16.mxu1 %v1352_v53 }
  0x5f   :  { %1261 = vmatmul.mubr.bf16.gmra.mxu1 %v1313_v33  ;;  %341 = vmatprep.mubr.bf16.mxu0 %v1600_v0 }
  0x60   :  { %1052 = vmatprep.mubr.bf16.mxu1 %v1600_v0  ;;  %952 = vmatpush1.bf16.msra.mxu0 %v1320_v34 }
  0x61   :  { %953 = vmatprep.subr.bf16.mxu0 %v1325_v35  ;;  %1025 = vmatpush1.bf16.msra.mxu1 %v1350_v54 }
  0x62   :  { %1026 = vmatprep.subr.bf16.mxu1 %v1358_v57 }
  0x64   :  { %954 = vmatpush1.bf16.msra.mxu0 %v1323_v36 }
  0x65   :  { %955 = vmatprep.subr.bf16.mxu0 %v1328_v37  ;;  %1027 = vmatpush1.bf16.msra.mxu1 %v1356_v58 }
  0x66   :  { %342 = vmatmul.mubr.bf16.gmra.mxu0 %v1312_v28  ;;  %1028 = vmatprep.subr.bf16.mxu1 %v1364_v61 }
  0x67   :  { %351 = vmatprep.mubr.bf16.mxu0 %v1600_v0 }
  0x68   :  { %956 = vmatpush1.bf16.msra.mxu0 %v1326_v38 }
  0x69   :  { %957 = vmatprep.subr.bf16.mxu0 %v1331_v39  ;;  %1029 = vmatpush1.bf16.msra.mxu1 %v1362_v62 }
  0x6a   :  { %1030 = vmatprep.subr.bf16.mxu1 %v1370_v2 }
  0x6c   :  { %958 = vmatpush1.bf16.msra.mxu0 %v1329_v40 }
  0x6d   :  { %959 = vmatprep.subr.bf16.mxu0 %v1334_v41  ;;  %1031 = vmatpush1.bf16.msra.mxu1 %v1368_v3 }
  0x6e   :  { %352 = vmatmul.mubr.bf16.gmra.mxu0 %v1313_v33  ;;  %1032 = vmatprep.subr.bf16.mxu1 %v1376_v6 }
  0x70   :  { %960 = vmatpush1.bf16.msra.mxu0 %v1332_v42 }
  0x71   :  { %961 = vmatprep.subr.bf16.mxu0 %v1337_v43  ;;  %1033 = vmatpush1.bf16.msra.mxu1 %v1374_v7 }
  0x72   :  { %1034 = vmatprep.subr.bf16.mxu1 %v1382_v10 }
  0x74   :  { %962 = vmatpush1.bf16.msra.mxu0 %v1335_v44 }
  0x75   :  { %963 = vmatprep.subr.bf16.mxu0 %v1343_v47  ;;  %1035 = vmatpush1.bf16.msra.mxu1 %v1380_v11 }
  0x78   :  { %964 = vmatpush2.bf16.msra.mxu0 %v1341_v48 }
  0x79   :  { %965 = vmatprep.subr.bf16.mxu0 %v1349_v51 }
  0x7c   :  { %966 = vmatpush2.bf16.msra.mxu0 %v1347_v52 }
  0x7d   :  { %967 = vmatprep.subr.bf16.mxu0 %v1355_v55 }
  0x80   :  { %968 = vmatpush2.bf16.msra.mxu0 %v1353_v56 }
  0x81   :  { %969 = vmatprep.subr.bf16.mxu0 %v1361_v59 }
  0x84   :  { %970 = vmatpush2.bf16.msra.mxu0 %v1359_v60 }
  0x85   :  { %971 = vmatprep.subr.bf16.mxu0 %v1367_v63 }
  0x88   :  { %972 = vmatpush2.bf16.msra.mxu0 %v1365_v1 }
  0x89   :  { %973 = vmatprep.subr.bf16.mxu0 %v1373_v4 }
  0x8c   :  { %974 = vmatpush2.bf16.msra.mxu0 %v1371_v5 }
  0x8d   :  { %975 = vmatprep.subr.bf16.mxu0 %v1379_v8 }
  0x90   :  { %976 = vmatpush2.bf16.msra.mxu0 %v1377_v9 }
  0x91   :  { %977 = vmatprep.subr.bf16.mxu0 %v1385_v12 }
  0x94   :  { %978 = vmatpush2.bf16.msra.mxu0 %v1383_v13 }
 0x116   :  { %v323_v23 = vpop.f32.mrf.mxu0 }
 0x117   :  { %v1258_v24 = vpop.f32.mrf.mxu1  ;;  %v324_v25 = vadd.f32 %v323_v23, %v1666_v20 }
 0x118   :  { %v405_v26 = vadd.f32 %v1258_v24, %v133_v21  ;;  %v325_v27 = vpop.f32.mrf.mxu0 }
 0x119   :  { %v396_v28 = vpop.f32.mrf.mxu1  ;;  %v1156_v29 = vmul.f32 -1.442695, %v324_v25  ;;  %v326_v31 = vadd.f32 %v325_v27, %v1670_v22 }
 0x11a   :  { %v1164_v30 = vmul.f32 -1.442695, %v405_v26  ;;  %v397_v32 = vadd.f32 %v396_v28, %v133_v21  ;;  %v327_v33 = vpop.f32.mrf.mxu0 }
 0x11b   :  { %v1259_v34 = vpop.f32.mrf.mxu1  ;;  %1386 = vpow2.f32 %v1156_v29  ;;  %v1157_v35 = vmul.f32 -1.442695, %v326_v31  ;;  %v328_v37 = vadd.f32 %v327_v33, %v1666_v20 }
 0x11c   :  { %v1158_v36 = vmul.f32 -1.442695, %v397_v32  ;;  %1388 = vpow2.f32 %v1164_v30  ;;  %v408_v38 = vadd.f32 %v1259_v34, %v133_v21  ;;  %v329_v39 = vpop.f32.mrf.mxu0 }
 0x11d   :  { %v399_v40 = vpop.f32.mrf.mxu1  ;;  %1390 = vpow2.f32 %v1157_v35  ;;  %v1159_v41 = vmul.f32 -1.442695, %v328_v37  ;;  %v330_v42 = vadd.f32 %v329_v39, %v1670_v22 }
 0x11e   :  { %v400_v43 = vadd.f32 %v399_v40, %v133_v21  ;;  %1392 = vpow2.f32 %v1158_v36  ;;  %v1167_v44 = vmul.f32 -1.442695, %v408_v38  ;;  %v333_v45 = vpop.f32.mrf.mxu0 }
 0x11f   :  { %v1262_v46 = vpop.f32.mrf.mxu1  ;;  %1394 = vpow2.f32 %v1159_v41  ;;  %v1160_v47 = vmul.f32 -1.442695, %v330_v42  ;;  %v334_v49 = vadd.f32 %v333_v45, %v1666_v20 }
 0x120   :  { %v1161_v48 = vmul.f32 -1.442695, %v400_v43  ;;  %1396 = vpow2.f32 %v1167_v44  ;;  %v335_v50 = vpop.f32.mrf.mxu0  ;;  %v421_v56 = vadd.f32 %v1262_v46, %v133_v21 }
 0x121   :  { %v412_v51 = vpop.f32.mrf.mxu1  ;;  %1398 = vpow2.f32 %v1160_v47  ;;  %v1162_v52 = vmul.f32 -1.442695, %v334_v49  ;;  %v336_v53 = vadd.f32 %v335_v50, %v1670_v22  ;;  %v571_v50 = vld [vmem:[#allocation2] sm:$0xff] }
 0x122   :  { %v413_v54 = vadd.f32 %v412_v51, %v133_v21  ;;  %1400 = vpow2.f32 %v1161_v48  ;;  %v337_v55 = vpop.f32.mrf.mxu0  ;;  %v1176_v5 = vmul.f32 -1.442695, %v421_v56  ;;  %v573_v56 = vld [vmem:[#allocation2 + $0xc] sm:$0xff] }
 0x123   :  { %v1263_v57 = vpop.f32.mrf.mxu1  ;;  %1402 = vpow2.f32 %v1162_v52  ;;  %v1163_v58 = vmul.f32 -1.442695, %v336_v53  ;;  %v338_v59 = vadd.f32 %v337_v55, %v1666_v20 }
 0x124   :  { %v1170_v60 = vmul.f32 -1.442695, %v413_v54  ;;  %v339_v61 = vpop.f32.mrf.mxu0  ;;  %v424_v62 = vadd.f32 %v1263_v57, %v133_v21 }
 0x125   :  { %v415_v63 = vpop.f32.mrf.mxu1  ;;  %1404 = vpow2.f32 %v1163_v58  ;;  %v1165_v1 = vmul.f32 -1.442695, %v338_v59  ;;  %v340_v2 = vadd.f32 %v339_v61, %v1670_v22 }
 0x126   :  { %v416_v3 = vadd.f32 %v415_v63, %v133_v21  ;;  %1406 = vpow2.f32 %v1170_v60  ;;  %v343_v4 = vpop.f32.mrf.mxu0  ;;  %v1179_v9 = vmul.f32 -1.442695, %v424_v62  ;;  %v587_v63 = vunpack.c.l.bf16 %v571_v50 }
 0x127   :  { %1408 = vpow2.f32 %v1165_v1  ;;  %v1166_v6 = vmul.f32 -1.442695, %v340_v2  ;;  %v344_v35 = vadd.f32 %v343_v4, %v1666_v20  ;;  %v572_v1 = vld [vmem:[#allocation2 + $0x8] ss:$12 sps:$4 sm:$0xff]  }
 0x128   :  { %v1173_v7 = vmul.f32 -1.442695, %v416_v3  ;;  %v1387_v8 = vpop.eup %1386  ;;  %v345_v10 = vpop.f32.mrf.mxu0 }
 0x129   :  { %v1389_v11 = vpop.eup %1388  ;;  %v499_v12 = vadd.f32 1.0, %v1387_v8  ;;  %1410 = vpow2.f32 %v1166_v6  ;;  %v346_v41 = vadd.f32 %v345_v10, %v1670_v22  ;;  %v1168_v44 = vmul.f32 -1.442695, %v344_v35  ;;  %v576_v10 = vld [vmem:[#allocation2 + $0x20] ss:$12 sps:$4 sm:$0xff]  }
 0x12a   :  { %v1391_v13 = vpop.eup %1390  ;;  %1412 = vpow2.f32 %v1173_v7  ;;  %v347_v14 = vpop.f32.mrf.mxu0  ;;  %v507_v30 = vadd.f32 1.0, %v1389_v11  ;;  %v588_v8 = vunpack.c.h.bf16 %v571_v50 }
 0x12b   :  { %v1393_v17 = vpop.eup %1392  ;;  %v500_v18 = vadd.f32 1.0, %v1391_v13  ;;  %1414 = vpow2.f32 %v1176_v5  ;;  %v348_v46 = vadd.f32 %v347_v14, %v1666_v20  ;;  %v1169_v53 = vmul.f32 -1.442695, %v346_v41 }
 0x12c   :  { %v1395_v23 = vpop.eup %1394  ;;  %v501_v21 = vadd.f32 1.0, %v1393_v17  ;;  %1416 = vpow2.f32 %v1179_v9  ;;  %v349_v24 = vpop.f32.mrf.mxu0  ;;  %v590_v5 = vunpack.c.l.bf16 %v573_v56  ;;  %v591_v9 = vunpack.c.h.bf16 %v573_v56  ;;  %v580_v56 = vld [vmem:[#allocation2 + $0x38] ss:$12 sps:$4 sm:$0xff]  }
 0x12d   :  { %v1397_v25 = vpop.eup %1396  ;;  %1418 = vrcp.f32 %v499_v12  ;;  %v502_v26 = vadd.f32 1.0, %v1395_v23  ;;  %v350_v49 = vadd.f32 %v349_v24, %v1670_v22  ;;  %v1171_v61 = vmul.f32 -1.442695, %v348_v46 }
 0x12e   :  { %v1399_v27 = vpop.eup %1398  ;;  %1420 = vrcp.f32 %v500_v18  ;;  %v353_v28 = vpop.f32.mrf.mxu0  ;;  %v510_v33 = vadd.f32 1.0, %v1397_v25  ;;  %v589_v13 = vunpack.c.l.bf16 %v572_v1  ;;  %v592_v14 = vunpack.c.h.bf16 %v572_v1 }
 0x12f   :  { %v1401_v29 = vpop.eup %1400  ;;  %1422 = vrcp.f32 %v502_v26  ;;  %v503_v31 = vadd.f32 1.0, %v1399_v27  ;;  %v354_v54 = vadd.f32 %v353_v28, %v1666_v20  ;;  %v1172_v3 = vmul.f32 -1.442695, %v350_v49 }
 0x130   :  { %v1403_v32 = vpop.eup %1402  ;;  %1424 = vrcp.f32 %v501_v21  ;;  %v504_v34 = vadd.f32 1.0, %v1401_v29  ;;  %v355_v36 = vpop.f32.mrf.mxu0  ;;  %v595_v24 = vunpack.c.l.bf16 %v576_v10  ;;  %v598_v28 = vunpack.c.h.bf16 %v576_v10 }
 0x131   :  { %1426 = vrcp.f32 %v503_v31  ;;  %v505_v37 = vadd.f32 1.0, %v1403_v32  ;;  %v356_v59 = vadd.f32 %v355_v36, %v1670_v22  ;;  %v1174_v7 = vmul.f32 -1.442695, %v354_v54  ;;  %v575_v36 = vld [vmem:[#allocation2 + $0x18] sm:$0xff] }
 0x132   :  { %v1405_v38 = vpop.eup %1404  ;;  %1428 = vrcp.f32 %v504_v34  ;;  %v357_v42 = vpop.f32.mrf.mxu0  ;;  %v593_v46 = vunpack.c.l.bf16 %v575_v36 }
 0x133   :  { %v1407_v39 = vpop.eup %1406  ;;  %1430 = vrcp.f32 %v507_v30  ;;  %v506_v40 = vadd.f32 1.0, %v1405_v38  ;;  %v358_v62 = vadd.f32 %v357_v42, %v1666_v20  ;;  %v1175_v12 = vmul.f32 -1.442695, %v356_v59 }
 0x134   :  { %v1409_v43 = vpop.eup %1408  ;;  %1432 = vrcp.f32 %v510_v33  ;;  %v513_v48 = vadd.f32 1.0, %v1407_v39  ;;  %v359_v55 = vpop.f32.mrf.mxu0 }
 0x135   :  { %1434 = vrcp.f32 %v505_v37  ;;  %v508_v45 = vadd.f32 1.0, %v1409_v43  ;;  %v360_v4 = vadd.f32 %v359_v55, %v1670_v22  ;;  %v1177_v17 = vmul.f32 -1.442695, %v358_v62  ;;  %v577_v22 = vld [vmem:[#allocation2 + $0x24] sm:$0xff] }
 0x136   :  { %v1411_v47 = vpop.eup %1410  ;;  %1436 = vrcp.f32 %v506_v40  ;;  %v596_v37 = vunpack.c.l.bf16 %v577_v22  ;;  %v594_v43 = vunpack.c.h.bf16 %v575_v36 }
 0x137   :  { %v1413_v51 = vpop.eup %1412  ;;  %1438 = vrcp.f32 %v508_v45  ;;  %v509_v52 = vadd.f32 1.0, %v1411_v47  ;;  %v1178_v23 = vmul.f32 -1.442695, %v360_v4 }
 0x138   :  { %v1415_v57 = vpop.eup %1414  ;;  %1440 = vpow2.f32 %v1168_v44  ;;  %v516_v58 = vadd.f32 1.0, %v1413_v51  ;;  %v597_v44 = vunpack.c.h.bf16 %v577_v22 }
 0x139   :  { %v1417_v60 = vpop.eup %1416  ;;  %1442 = vrcp.f32 %v509_v52  ;;  %v519_v34 = vadd.f32 1.0, %v1415_v57 }
 0x13a   :  { %v1419_v2 = vpop.eup %1418  ;;  %1444 = vrcp.f32 %v513_v48  ;;  %v522_v39 = vadd.f32 1.0, %v1417_v60 }
 0x13b   :  { %v1421_v6 = vpop.eup %1420  ;;  %1446 = vpow2.f32 %v1169_v53  ;;  %v611_v30 = vmul.f32 %v1419_v2, %v587_v63  ;;  %v601_v2 = vunpack.c.l.bf16 %v580_v56 }
 0x13c   :  { %v1423_v11 = vpop.eup %1422  ;;  %1448 = vrcp.f32 %v516_v58  ;;  %v612_v26 = vmul.f32 %v1421_v6, %v588_v8 }
 0x13d   :  { %v1425_v20 = vpop.eup %1424  ;;  %1450 = vpow2.f32 %v1171_v61  ;;  %v614_v21 = vmul.f32 %v1423_v11, %v590_v5 }
 0x13e   :  { %v1427_v18 = vpop.eup %1426  ;;  %1452 = vpow2.f32 %v1172_v3  ;;  %v613_v31 = vmul.f32 %v1425_v20, %v589_v13  ;;  %v604_v3 = vunpack.c.h.bf16 %v580_v56  ;;  %v584_v20 = vld [vmem:[#allocation2 + $0x50] ss:$12 sps:$4 sm:$0xff]  }
 0x13f   :  { %v1429_v25 = vpop.eup %1428  ;;  %1454 = vpow2.f32 %v1174_v7  ;;  %v615_v27 = vmul.f32 %v1427_v18, %v591_v9  ;;  %v635_v41 = vpack.c.bf16 %v614_v21, %v611_v30  ;;  %v607_v22 = vunpack.c.l.bf16 %v584_v20 }
 0x140   :  { %v1431_v29 = vpop.eup %1430  ;;  %1456 = vpow2.f32 %v1175_v12  ;;  %v616_v32 = vmul.f32 %v1429_v25, %v592_v14 }
 0x141   :  { %v1433_v33 = vpop.eup %1432  ;;  %1458 = vpow2.f32 %v1177_v17  ;;  %v636_v35 = vpack.c.bf16 %v615_v27, %v612_v26  ;;  %v619_v49 = vmul.f32 %v1431_v29, %v595_v24  ;;  %v610_v24 = vunpack.c.h.bf16 %v584_v20  ;;  %v581_v26 = vld [vmem:[#allocation2 + $0x3c] sm:$0xff]  ;;  %v579_v27 = vld [vmem:[#allocation2 + $0x30] sm:$0xff] }
 0x142   :  { %v1435_v38 = vpop.eup %1434  ;;  %1460 = vpow2.f32 %v1178_v23  ;;  %v637_v40 = vpack.c.bf16 %v616_v32, %v613_v31  ;;  %v622_v50 = vmul.f32 %v1433_v33, %v598_v28  ;;  %v602_v30 = vunpack.c.l.bf16 %v581_v26 }
 0x143   :  { %v1437_v42 = vpop.eup %1436  ;;  %979 = vmatprep.mubr.bf16.mxu0 %v636_v35  ;;  %1462 = vrcp.f32 %v519_v34  ;;  %v617_v58 = vmul.f32 %v1435_v38, %v593_v46  ;;  %v600_v32 = vunpack.c.h.bf16 %v579_v27  ;;  %v603_v33 = vunpack.c.h.bf16 %v581_v26 }
 0x144   :  { %v1439_v45 = vpop.eup %1438  ;;  %1053 = vmatmul.mubr.bf16.vlgmr.msra.gmra.mxu1 %v637_v40  ;;  %980 = vmatmul.mubr.bf16.vlgmr.msra.gmra.mxu0 %v635_v41  ;;  %1464 = vrcp.f32 %v522_v39  ;;  %v618_v54 = vmul.f32 %v1437_v42, %v594_v43  ;;  %v640_v63 = vpack.c.bf16 %v622_v50, %v619_v49  ;;  %v599_v35 = vunpack.c.l.bf16 %v579_v27  ;;  %v583_v40 = vld [vmem:[#allocation2 + $0x48] sm:$0xff]  ;;  %v585_v41 = vld [vmem:[#allocation2 + $0x54] sm:$0xff] }
 0x145   :  { %v1441_v47 = vpop.eup %1440  ;;  %1062 = vmatprep.mubr.bf16.mxu1 %v1600_v0  ;;  %v620_v51 = vmul.f32 %v1439_v45, %v596_v37  ;;  %v609_v45 = vunpack.c.h.bf16 %v585_v41  ;;  %v608_v50 = vunpack.c.l.bf16 %v585_v41 }
 0x146   :  { %v1443_v48 = vpop.eup %1442  ;;  %v511_v53 = vadd.f32 1.0, %v1441_v47 }
 0x147   :  { %v1445_v52 = vpop.eup %1444  ;;  %v621_v55 = vmul.f32 %v1443_v48, %v597_v44  ;;  %v638_v1 = vpack.c.bf16 %v620_v51, %v617_v58  ;;  %v606_v44 = vunpack.c.h.bf16 %v583_v40 }
 0x148   :  { %v1447_v57 = vpop.eup %1446  ;;  %1466 = vrcp.f32 %v511_v53  ;;  %v625_v11 = vmul.f32 %v1445_v52, %v601_v2 }
 0x149   :  { %v1449_v59 = vpop.eup %1448  ;;  %v512_v60 = vadd.f32 1.0, %v1447_v57  ;;  %v639_v61 = vpack.c.bf16 %v621_v55, %v618_v54  ;;  %v605_v54 = vunpack.c.l.bf16 %v583_v40 }
 0x14a   :  { %v1451_v62 = vpop.eup %1450  ;;  %v628_v12 = vmul.f32 %v1449_v59, %v604_v3 }
 0x14b   :  { %v1453_v4 = vpop.eup %1452  ;;  %v514_v5 = vadd.f32 1.0, %v1451_v62  ;;  %989 = vmatprep.mubr.bf16.mxu0 %v639_v61  ;;  %1468 = vrcp.f32 %v512_v60  ;;  %v695_v60 = vld [vmem:[%s1726_s5] sm:$0x3]  ;;  %s1601_s5 = smov [#allocation10]  }
 0x14c   :  { %v1455_v6 = vpop.eup %1454  ;;  %v515_v7 = vadd.f32 1.0, %v1453_v4  ;;  %1063 = vmatmul.mubr.bf16.gmra.mxu1 %v640_v63  ;;  %990 = vmatmul.mubr.bf16.gmra.mxu0 %v638_v1  ;;  %v643_v21 = vpack.c.bf16 %v628_v12, %v625_v11  ;;  %v1696_v61 = vrot.slane %v695_v60, %v124_v16  ;;  %v1700_v62 = vrot.slane %v695_v60, %v128_v19  ;;  %s1114_s22 = sshll.u32 %s1601_s5, 4  ;;  %s1115_s22 = int_to_ptr.vmem [resolvable:$true] %s1114_s22 }
 0x14d   :  { %v1457_v8 = vpop.eup %1456  ;;  %1470 = vrcp.f32 %v514_v5  ;;  %1072 = vmatprep.mubr.bf16.mxu1 %v1600_v0  ;;  %v517_v18 = vadd.f32 1.0, %v1455_v6  ;;  %s1562_s23 = scalar_lea.vmem %s1115_s22, 2048  ;;  %p1567_p7 = scmp.lt.s32.totalorder %s1115_s22, %s1115_s22 }
 0x14e   :  { %v1459_v9 = vpop.eup %1458  ;;  %1472 = vrcp.f32 %v515_v7  ;;  %v518_v10 = vadd.f32 1.0, %v1457_v8  ;;  %p1563_p6 = scmp.ne.s32.totalorder %s1115_s22, %s1562_s23  ;;  %p1568_p8 = scmp.lt.s32.totalorder %s1562_s23, %s1562_s23 }
 0x14f   :  { %v1461_v13 = vpop.eup %1460  ;;  %v520_v14 = vadd.f32 1.0, %v1459_v9 }
 0x150   :  { %1474 = vrcp.f32 %v518_v10  ;;  %v521_v17 = vadd.f32 1.0, %v1461_v13  ;;  %v1463_v23 = vpop.eup %1462  ;;  %p1569_p9 = por %p1568_p8, %p1567_p7 }
 0x151   :  { %v1465_v25 = vpop.eup %1464  ;;  %v631_v28 = vmul.f32 %v1463_v23, %v607_v22 }
 0x152   :  { %1476 = vrcp.f32 %v521_v17  ;;  %v634_v29 = vmul.f32 %v1465_v25, %v610_v24  ;;  %p1570_p10 = pnand %p1569_p9, %p1563_p6 }
 0x153   :  { %1478 = vrcp.f32 %v520_v14 }
 0x154   :  { %1073 = vmatmul.mubr.bf16.gmra.mxu1 %v643_v21  ;;  %1480 = vrcp.f32 %v517_v18  ;;  %v646_v37 = vpack.c.bf16 %v634_v29, %v631_v28 }
 0x155   :  { %1082 = vmatprep.mubr.bf16.mxu1 %v1600_v0  ;;  %v1467_v31 = vpop.eup %1466 }
 0x156   :  { %v623_v46 = vmul.f32 %v1467_v31, %v599_v35 }
 0x158   :  { %v1469_v34 = vpop.eup %1468 }
 0x159   :  { %v624_v42 = vmul.f32 %v1469_v34, %v600_v32 }
 0x15a   :  { %v1471_v36 = vpop.eup %1470 }
 0x15b   :  { %v1473_v38 = vpop.eup %1472  ;;  %v626_v39 = vmul.f32 %v1471_v36, %v602_v30 }
 0x15c   :  { %v627_v43 = vmul.f32 %v1473_v38, %v603_v33  ;;  %1083 = vmatmul.mubr.bf16.gmra.mxu1 %v646_v37 }
 0x15d   :  { %v1475_v0 = vpop.eup %1474  ;;  %v641_v49 = vpack.c.bf16 %v626_v39, %v623_v46 }
 0x15e   :  { %v642_v47 = vpack.c.bf16 %v627_v43, %v624_v42  ;;  %v630_v52 = vmul.f32 %v1475_v0, %v606_v44 }
 0x15f   :  { %v1477_v48 = vpop.eup %1476 }
 0x160   :  { %v1479_v51 = vpop.eup %1478  ;;  %999 = vmatprep.mubr.bf16.mxu0 %v642_v47  ;;  %v633_v53 = vmul.f32 %v1477_v48, %v609_v45 }
 0x161   :  { %1000 = vmatmul.mubr.bf16.gmra.mxu0 %v641_v49  ;;  %v1481_v55 = vpop.eup %1480  ;;  %v632_v57 = vmul.f32 %v1479_v51, %v608_v50 }
 0x162   :  { %v645_v56 = vpack.c.bf16 %v633_v53, %v630_v52  ;;  %v629_v58 = vmul.f32 %v1481_v55, %v605_v54 }
 0x164   :  { %1009 = vmatprep.mubr.bf16.mxu0 %v645_v56  ;;  %v644_v59 = vpack.c.bf16 %v632_v57, %v629_v58 }
 0x169   :  { %1010 = vmatmul.mubr.bf16.gmra.mxu0 %v644_v59 }
 0x204   :  { %v1054_v63 = vpop.f32.mrf.mxu1  ;;  %v981_v1 = vpop.f32.mrf.mxu0 }
 0x205   :  { %v982_v2 = vadd.f32 %v981_v1, %v1696_v61 }
 0x206   :  { %v1056_v3 = vpop.f32.mrf.mxu1  ;;  %v983_v4 = vpop.f32.mrf.mxu0 }
 0x207   :  { %v1055_v5 = vadd.f32 %v1054_v63, %v982_v2  ;;  %v984_v6 = vadd.f32 %v983_v4, %v1700_v62 }
 0x208   :  { %v1058_v7 = vpop.f32.mrf.mxu1  ;;  %v985_v8 = vpop.f32.mrf.mxu0 }
 0x209   :  { %1093 = vst [vmem:[#allocation10] sm:$0xff] %v1055_v5  ;;  %v1057_v9 = vadd.f32 %v1056_v3, %v984_v6  ;;  %v986_v16 = vadd.f32 %v985_v8, %v1696_v61 }
 0x20a   :  { %v1060_v10 = vpop.f32.mrf.mxu1  ;;  %v987_v11 = vpop.f32.mrf.mxu0 }
 0x20b   :  { %1094 = vst [vmem:[#allocation10 + $0x8] sm:$0xff] %v1057_v9  ;;  %v1059_v15 = vadd.f32 %v1058_v7, %v986_v16  ;;  %v988_v19 = vadd.f32 %v987_v11, %v1700_v62 }
 0x20c   :  { %v1064_v12 = vpop.f32.mrf.mxu1  ;;  %v991_v13 = vpop.f32.mrf.mxu0 }
 0x20d   :  { %1095 = vst [vmem:[#allocation10 + $0x10] sm:$0xff] %v1059_v15  ;;  %v1061_v14 = vadd.f32 %v1060_v10, %v988_v19  ;;  %v992_v20 = vadd.f32 %v991_v13, %v1696_v61 }
 0x20e   :  { %v1066_v17 = vpop.f32.mrf.mxu1  ;;  %v993_v18 = vpop.f32.mrf.mxu0 }
 0x20f   :  { %1096 = vst [vmem:[#allocation10 + $0x18] sm:$0xff] %v1061_v14  ;;  %v1065_v23 = vadd.f32 %v1064_v12, %v992_v20  ;;  %v994_v21 = vadd.f32 %v993_v18, %v1700_v62 }
 0x210   :  { %v1068_v22 = vpop.f32.mrf.mxu1  ;;  %v995_v24 = vpop.f32.mrf.mxu0 }
 0x211   :  { %1097 = vst [vmem:[#allocation10 + $0x20] sm:$0xff] %v1065_v23  ;;  %v1067_v25 = vadd.f32 %v1066_v17, %v994_v21  ;;  %v996_v26 = vadd.f32 %v995_v24, %v1696_v61 }
 0x212   :  { %v1070_v27 = vpop.f32.mrf.mxu1  ;;  %v997_v28 = vpop.f32.mrf.mxu0 }
 0x213   :  { %1098 = vst [vmem:[#allocation10 + $0x28] sm:$0xff] %v1067_v25  ;;  %v1069_v29 = vadd.f32 %v1068_v22, %v996_v26  ;;  %v998_v30 = vadd.f32 %v997_v28, %v1700_v62 }
 0x214   :  { %v1074_v32 = vpop.f32.mrf.mxu1 }
 0x215   :  { %1099 = vst [vmem:[#allocation10 + $0x30] sm:$0xff] %v1069_v29  ;;  %v1071_v31 = vadd.f32 %v1070_v27, %v998_v30 }
 0x216   :  { %v1076_v33 = vpop.f32.mrf.mxu1 }
 0x217   :  { %1100 = vst [vmem:[#allocation10 + $0x38] sm:$0xff] %v1071_v31 }
 0x218   :  { %v1078_v34 = vpop.f32.mrf.mxu1 }
 0x21a   :  { %v1080_v36 = vpop.f32.mrf.mxu1 }
 0x21c   :  { %v1084_v42 = vpop.f32.mrf.mxu1 }
 0x21e   :  { %v1086_v48 = vpop.f32.mrf.mxu1 }
 0x220   :  { %v1088_v54 = vpop.f32.mrf.mxu1 }
 0x221   :  { %v1001_v35 = vpop.f32.mrf.mxu0 }
 0x222   :  { %v1002_v37 = vadd.f32 %v1001_v35, %v1696_v61  ;;  %v1090_v63 = vpop.f32.mrf.mxu1 }
 0x223   :  { %v1003_v38 = vpop.f32.mrf.mxu0 }
 0x224   :  { %v1075_v39 = vadd.f32 %v1074_v32, %v1002_v37  ;;  %v1004_v40 = vadd.f32 %v1003_v38, %v1700_v62 }
 0x225   :  { %v1005_v41 = vpop.f32.mrf.mxu0 }
 0x226   :  { %1101 = vst [vmem:[#allocation10 + $0x40] sm:$0xff] %v1075_v39  ;;  %v1077_v43 = vadd.f32 %v1076_v33, %v1004_v40  ;;  %v1006_v44 = vadd.f32 %v1005_v41, %v1696_v61 }
 0x227   :  { %v1007_v45 = vpop.f32.mrf.mxu0 }
 0x228   :  { %1102 = vst [vmem:[#allocation10 + $0x48] sm:$0xff] %v1077_v43  ;;  %v1079_v0 = vadd.f32 %v1078_v34, %v1006_v44  ;;  %v1008_v46 = vadd.f32 %v1007_v45, %v1700_v62 }
 0x229   :  { %v1011_v47 = vpop.f32.mrf.mxu0 }
 0x22a   :  { %1103 = vst [vmem:[#allocation10 + $0x50] sm:$0xff] %v1079_v0  ;;  %v1081_v49 = vadd.f32 %v1080_v36, %v1008_v46  ;;  %v1012_v50 = vadd.f32 %v1011_v47, %v1696_v61 }
 0x22b   :  { %v1013_v51 = vpop.f32.mrf.mxu0 }
 0x22c   :  { %1104 = vst [vmem:[#allocation10 + $0x58] sm:$0xff] %v1081_v49  ;;  %v1085_v52 = vadd.f32 %v1084_v42, %v1012_v50  ;;  %v1014_v53 = vadd.f32 %v1013_v51, %v1700_v62 }
 0x22d   :  { %v1015_v55 = vpop.f32.mrf.mxu0 }
 0x22e   :  { %1105 = vst [vmem:[#allocation10 + $0x60] sm:$0xff] %v1085_v52  ;;  %v1087_v56 = vadd.f32 %v1086_v48, %v1014_v53  ;;  %v1016_v57 = vadd.f32 %v1015_v55, %v1696_v61 }
 0x22f   :  { %v1017_v58 = vpop.f32.mrf.mxu0 }
 0x230   :  { %1106 = vst [vmem:[#allocation10 + $0x68] sm:$0xff] %v1087_v56  ;;  %v1089_v59 = vadd.f32 %v1088_v54, %v1016_v57  ;;  %v1018_v60 = vadd.f32 %v1017_v58, %v1700_v62 }
 0x232   :  { %1107 = vst [vmem:[#allocation10 + $0x70] sm:$0xff] %v1089_v59  ;;  %v1091_v1 = vadd.f32 %v1090_v63, %v1018_v60 }
 0x234   :  { %1108 = vst [vmem:[#allocation10 + $0x78] sm:$0xff] %v1091_v1 }
 0x235   :  { %1573 = shalt.err (!%p1570_p10)
}
 0x236   :  { %s1602_s24 = smov 256   ;;  %s1603_s25 = smov 16  }
 0x237   :  { %1120 = dma.vmem_to_hbm [thread:$0]  %s1115_s22, 2048, %s1727_s6, [#allocation4], %s1602_s24, %s1602_s24, %s1603_s25  }
 0x238   :  { %1588 = dma.done.wait [#allocation4], 2048  }
 0x239   :  { %1589 = vsyncadd [#allocation4], 4294965248 }
 0x23a   :  { %1124 = vsyncpa [#allocation3], 1 }
 0x23b   :  { %1125 = vsyncpa [#allocation6], 1 }
 0x23c   :  { %1126 = vsyncpa [#allocation9], 1 }
 0x23d   :  { %1127 = vsyncpa [#allocation4], 1 }

</bundles_post_ra>
